<compile_context>
chip_gen: v7x
topology: tpu7x:2x2x1
jax: 0.10.0
libtpu: 0.0.40
codegen_flags: <defaults>
</compile_context>

<pallas_src>
import jax
import jax.numpy as jnp
from jax import lax
from jax.experimental import pallas as pl
from jax.experimental.pallas import tpu as pltpu

EMBEDDING_DIM = 32   # embedding_dim
FEED_NUM = 64        # feed_num
LN_EPS = 1e-5
LANES = 128

# Row indices inside the packed (NUM_VECS, WIDE) parameter-vector operand.
# The first eight rows hold 128-lane (pack*E) vectors, the last holds the 256-lane (pack*F) b1.
_BA, _G1, _BE1, _B2, _GF, _BF, _G2, _BE2, _B1 = range(9)
NUM_VECS = 9


def _gelu_exact(v):
    return 0.5 * v * (1.0 + lax.erf(v * (1.0 / jnp.sqrt(2.0).astype(v.dtype))))


def block_kernel(x_ref, wa_ref, w1_ref, w2_ref, mln_ref, vec_ref, o_ref):
    # x_ref: (R, 128) lane-packed — 4 consecutive E=32 rows per 128-lane row.
    xp = x_ref[...].astype(jnp.float32)
    mln = mln_ref[...]                       # (128,128) block-diag (1/E)-ones: group mean on MXU

    def vec128(i):                           # static slices of the packed param operand (free)
        return vec_ref[i:i + 1, :LANES]

    ba, g1, be1 = vec128(_BA), vec128(_G1), vec128(_BE1)
    b2, gf, bf = vec128(_B2), vec128(_GF), vec128(_BF)
    g2, be2 = vec128(_G2), vec128(_BE2)
    b1 = vec_ref[_B1:_B1 + 1, :]             # (1, pack*F) = (1, 256)

    def ln(v, g, b):
        # Per-32-lane-group LayerNorm (biased var, eps=1e-5). The block-diagonal matmul
        # produces each group's mean already broadcast across that group's 32 lanes.
        mu = jnp.dot(v, mln, preferred_element_type=jnp.float32)
        d = v - mu
        var = jnp.dot(d * d, mln, preferred_element_type=jnp.float32)
        return d * lax.rsqrt(var + LN_EPS) * g + b

    # Multi_Head_Attention: GELU(Linear(x))     (block-diag Wa: K=128)
    att = _gelu_exact(
        jnp.dot(xp, wa_ref[...], preferred_element_type=jnp.float32) + ba)

    # Norm #1 + residual
    adn1 = xp + ln(att, g1, be1)

    # Feed_Forward: Linear -> GELU -> Linear -> LayerNorm -> (Dropout=identity)
    h = _gelu_exact(
        jnp.dot(adn1, w1_ref[...], preferred_element_type=jnp.float32) + b1)
    l2 = jnp.dot(h, w2_ref[...], preferred_element_type=jnp.float32) + b2
    ff = ln(l2, gf, bf)

    # Norm #2 + residual — store is a full-width, unmasked (R, 128) vst.
    o_ref[...] = (adn1 + ln(ff, g2, be2)).astype(o_ref.dtype)


def block_forward(x, params, *, row_tile=1024):
    """x: (B, S, E) float32. params: dict of weights in PyTorch layout."""
    B, S, E = x.shape
    F = params["w1"].shape[0]                 # (F, E) PyTorch layout
    assert LANES % E == 0, "lane packing assumes E divides 128"
    pack = LANES // E                          # 4 consecutive rows per 128-lane packed row
    WIDE = pack * F                            # 256 packed hidden lanes

    rows = B * S
    mult = 8 * pack                            # packed sublane rows must be 8-aligned
    row_tile = max(mult, (row_tile // mult) * mult)
    min_rows = mult * pl.cdiv(rows, mult)      # smallest legal padded extent
    if min_rows >= 2 * mult:
        # Cap tile so the grid has >= 2 steps (v7x has 2 TensorCores; "parallel" only
        # shards work if there is more than one grid step).
        row_tile = min(row_tile, (min_rows // 2) // mult * mult)
    else:
        row_tile = min(row_tile, min_rows)     # don't over-pad tiny inputs
    padded_rows = row_tile * pl.cdiv(rows, row_tile)
    grid = padded_rows // row_tile
    rt_p = row_tile // pack                    # packed sublane rows per grid step

    # Lane-dense pack of x: 4 consecutive E-rows per 128-lane row; pure row-major reshape.
    x2d = x.reshape(rows, E)
    if padded_rows != rows:
        # Padded tail rows run LayerNorm on all-zeros (var=0); eps keeps it finite and the
        # rows are sliced off after the call. Do NOT "optimize" the padding away.
        x2d = jnp.pad(x2d, ((0, padded_rows - rows), (0, 0)))
    xp = x2d.reshape(padded_rows // pack, LANES)

    # Block-diagonal weights (PyTorch (out,in) -> (in,out), then kron with I_pack).
    eye = jnp.eye(pack, dtype=jnp.float32)
    wa_p = jnp.kron(eye, params["wa"].T.astype(jnp.float32))        # (128, 128)
    w1_p = jnp.kron(eye, params["w1"].T.astype(jnp.float32))        # (128, 256)
    w2_p = jnp.kron(eye, params["w2"].T.astype(jnp.float32))        # (256, 128)
    m_ln = jnp.kron(eye, jnp.full((E, E), 1.0 / E, jnp.float32))    # (128, 128) group-mean op

    # Pack all 1-D bias / scale vectors (tiled pack x along lanes) into one (NUM_VECS, WIDE) operand.
    def _row(v):
        v = jnp.tile(v.astype(jnp.float32), pack)
        return jnp.pad(v, (0, WIDE - v.shape[0]))

    vec = jnp.stack([_row(params["ba"]), _row(params["g1"]), _row(params["be1"]),
                     _row(params["b2"]), _row(params["gf"]), _row(params["bf"]),
                     _row(params["g2"]), _row(params["be2"]), _row(params["b1"])],
                    axis=0)                    # (9, 256)

    full = lambda shape: pl.BlockSpec(shape, lambda i: (0, 0))

    out_packed = pl.pallas_call(
        block_kernel,
        out_shape=jax.ShapeDtypeStruct((padded_rows // pack, LANES), x.dtype),
        grid_spec=pltpu.PrefetchScalarGridSpec(
            num_scalar_prefetch=0,
            grid=(grid,),
            in_specs=[
                pl.BlockSpec((rt_p, LANES), lambda i: (i, 0)),   # packed x rows
                full((LANES, LANES)),                            # wa (block-diag)
                full((LANES, WIDE)),                             # w1 (block-diag)
                full((WIDE, LANES)),                             # w2 (block-diag)
                full((LANES, LANES)),                            # LN group-mean matrix
                full((NUM_VECS, WIDE)),                          # packed biases/scales
            ],
            out_specs=pl.BlockSpec((rt_p, LANES), lambda i: (i, 0)),
        ),
        compiler_params=pltpu.CompilerParams(
            dimension_semantics=("parallel",)),
    )(xp, wa_p, w1_p, w2_p, m_ln, vec)

    # Unpack: pure row-major reshape (consecutive-row grouping), then drop padding.
    out2d = out_packed.reshape(padded_rows, E)[:rows]
    return out2d.reshape(B, S, E)


def init_params(key, E=EMBEDDING_DIM, F=FEED_NUM):
    ks = jax.random.split(key, 6)
    scale = 0.02
    return {
        # Multi_Head_Attention.linear : Linear(E, E)
        "wa": scale * jax.random.normal(ks[0], (E, E), jnp.float32),
        "ba": scale * jax.random.normal(ks[1], (E,), jnp.float32),
        # norm1
        "g1": jnp.ones((E,), jnp.float32),
        "be1": jnp.zeros((E,), jnp.float32),
        # Feed_Forward.linear1 : Linear(E, F)
        "w1": scale * jax.random.normal(ks[2], (F, E), jnp.float32),
        "b1": scale * jax.random.normal(ks[3], (F,), jnp.float32),
        # Feed_Forward.linear2 : Linear(F, E)
        "w2": scale * jax.random.normal(ks[4], (E, F), jnp.float32),
        "b2": scale * jax.random.normal(ks[5], (E,), jnp.float32),
        # Feed_Forward.norm
        "gf": jnp.ones((E,), jnp.float32),
        "bf": jnp.zeros((E,), jnp.float32),
        # norm2
        "g2": jnp.ones((E,), jnp.float32),
        "be2": jnp.zeros((E,), jnp.float32),
    }


def _reference(x, p):
    """Pure-JAX reference (matches PyTorch eval-mode forward)."""
    def gelu(v): return 0.5 * v * (1.0 + lax.erf(v / jnp.sqrt(2.0)))
    def ln(v, g, b):
        mu = jnp.mean(v, -1, keepdims=True)
        var = jnp.mean((v - mu) ** 2, -1, keepdims=True)
        return (v - mu) / jnp.sqrt(var + LN_EPS) * g + b
    att = gelu(x @ p["wa"].T + p["ba"])
    adn1 = x + ln(att, p["g1"], p["be1"])
    h = gelu(adn1 @ p["w1"].T + p["b1"])
    ff = ln(h @ p["w2"].T + p["b2"], p["gf"], p["bf"])
    return adn1 + ln(ff, p["g2"], p["be2"])


if __name__ == "__main__":
    key = jax.random.PRNGKey(0)
    k_x, k_p = jax.random.split(key)
    B, S, E = 2, 8, EMBEDDING_DIM
    x = jax.random.normal(k_x, (B, S, E), jnp.float32)
    params = init_params(k_p)

    out = block_forward(x, params)
    out = jax.block_until_ready(out)

    ref = _reference(x, params)
    assert out.shape == (B, S, E)
    assert jnp.allclose(out, ref, atol=1e-4, rtol=1e-4), "mismatch vs JAX reference"
    print("KERNEL_OK")
</pallas_src>

<mosaic_0001>
module attributes {stable_mosaic.version = 11 : i64} {
  func.func @block_kernel(%arg0: i32, %arg1: memref<8x128xf32, #tpu.memory_space<vmem>>, %arg2: memref<128x128xf32, #tpu.memory_space<vmem>>, %arg3: memref<128x256xf32, #tpu.memory_space<vmem>>, %arg4: memref<256x128xf32, #tpu.memory_space<vmem>>, %arg5: memref<128x128xf32, #tpu.memory_space<vmem>>, %arg6: memref<9x256xf32, #tpu.memory_space<vmem>>, %arg7: memref<8x128xf32, #tpu.memory_space<vmem>>) attributes {dimension_semantics = [#tpu.dimension_semantics<parallel>], iteration_bounds = array<i64: 1>, scalar_prefetch = 0 : i64, scratch_operands = 0 : i64, tpu.core_type = #tpu.core_type<tc>, window_params = [{transform_indices = @transform_0, window_bounds = array<i64: 8, 128>}, {pipeline_mode = #tpu.pipeline_mode<synchronous>, transform_indices = @transform_1, window_bounds = array<i64: 128, 128>}, {pipeline_mode = #tpu.pipeline_mode<synchronous>, transform_indices = @transform_2, window_bounds = array<i64: 128, 256>}, {pipeline_mode = #tpu.pipeline_mode<synchronous>, transform_indices = @transform_3, window_bounds = array<i64: 256, 128>}, {pipeline_mode = #tpu.pipeline_mode<synchronous>, transform_indices = @transform_4, window_bounds = array<i64: 128, 128>}, {pipeline_mode = #tpu.pipeline_mode<synchronous>, transform_indices = @transform_5, window_bounds = array<i64: 9, 256>}, {transform_indices = @transform_6, window_bounds = array<i64: 8, 128>}]} {
    %c0 = arith.constant 0 : index
    %c0_0 = arith.constant 0 : index
    %0 = vector.load %arg1[%c0, %c0_0] : memref<8x128xf32, #tpu.memory_space<vmem>>, vector<8x128xf32>
    %c0_1 = arith.constant 0 : index
    %c0_2 = arith.constant 0 : index
    %1 = vector.load %arg5[%c0_1, %c0_2] : memref<128x128xf32, #tpu.memory_space<vmem>>, vector<128x128xf32>
    %c0_3 = arith.constant 0 : index
    %c0_4 = arith.constant 0 : index
    %2 = vector.load %arg6[%c0_3, %c0_4] : memref<9x256xf32, #tpu.memory_space<vmem>>, vector<1x128xf32>
    %c1 = arith.constant 1 : index
    %c0_5 = arith.constant 0 : index
    %3 = vector.load %arg6[%c1, %c0_5] : memref<9x256xf32, #tpu.memory_space<vmem>>, vector<1x128xf32>
    %c2 = arith.constant 2 : index
    %c0_6 = arith.constant 0 : index
    %4 = vector.load %arg6[%c2, %c0_6] : memref<9x256xf32, #tpu.memory_space<vmem>>, vector<1x128xf32>
    %c3 = arith.constant 3 : index
    %c0_7 = arith.constant 0 : index
    %5 = vector.load %arg6[%c3, %c0_7] : memref<9x256xf32, #tpu.memory_space<vmem>>, vector<1x128xf32>
    %c4 = arith.constant 4 : index
    %c0_8 = arith.constant 0 : index
    %6 = vector.load %arg6[%c4, %c0_8] : memref<9x256xf32, #tpu.memory_space<vmem>>, vector<1x128xf32>
    %c5 = arith.constant 5 : index
    %c0_9 = arith.constant 0 : index
    %7 = vector.load %arg6[%c5, %c0_9] : memref<9x256xf32, #tpu.memory_space<vmem>>, vector<1x128xf32>
    %c6 = arith.constant 6 : index
    %c0_10 = arith.constant 0 : index
    %8 = vector.load %arg6[%c6, %c0_10] : memref<9x256xf32, #tpu.memory_space<vmem>>, vector<1x128xf32>
    %c7 = arith.constant 7 : index
    %c0_11 = arith.constant 0 : index
    %9 = vector.load %arg6[%c7, %c0_11] : memref<9x256xf32, #tpu.memory_space<vmem>>, vector<1x128xf32>
    %c8 = arith.constant 8 : index
    %c0_12 = arith.constant 0 : index
    %10 = vector.load %arg6[%c8, %c0_12] : memref<9x256xf32, #tpu.memory_space<vmem>>, vector<1x256xf32>
    %c0_13 = arith.constant 0 : index
    %c0_14 = arith.constant 0 : index
    %11 = vector.load %arg2[%c0_13, %c0_14] : memref<128x128xf32, #tpu.memory_space<vmem>>, vector<128x128xf32>
    %cst = arith.constant dense<0.000000e+00> : vector<8x128xf32>
    %12 = tpu.matmul %0, %11, %cst {dimension_numbers = #tpu.dot_dimension_numbers<[1], [0], [0], [1], [0, 0, 1, 1], [], []>} : vector<8x128xf32>, vector<128x128xf32>, vector<8x128xf32> -> vector<8x128xf32>
    %13 = vector.broadcast %2 : vector<1x128xf32> to vector<8x128xf32>
    %14 = arith.addf %12, %13 : vector<8x128xf32>
    %cst_15 = arith.constant 5.000000e-01 : f32
    %15 = vector.broadcast %cst_15 : f32 to vector<8x128xf32>
    %16 = arith.mulf %15, %14 : vector<8x128xf32>
    %cst_16 = arith.constant 2.000000e+00 : f32
    %17 = math.sqrt %cst_16 : f32
    %cst_17 = arith.constant 1.000000e+00 : f32
    %18 = arith.divf %cst_17, %17 : f32
    %19 = vector.broadcast %18 : f32 to vector<8x128xf32>
    %20 = arith.mulf %14, %19 : vector<8x128xf32>
    %21 = math.erf %20 : vector<8x128xf32>
    %cst_18 = arith.constant 1.000000e+00 : f32
    %22 = vector.broadcast %cst_18 : f32 to vector<8x128xf32>
    %23 = arith.addf %22, %21 : vector<8x128xf32>
    %24 = arith.mulf %16, %23 : vector<8x128xf32>
    %cst_19 = arith.constant dense<0.000000e+00> : vector<8x128xf32>
    %25 = tpu.matmul %24, %1, %cst_19 {dimension_numbers = #tpu.dot_dimension_numbers<[1], [0], [0], [1], [0, 0, 1, 1], [], []>} : vector<8x128xf32>, vector<128x128xf32>, vector<8x128xf32> -> vector<8x128xf32>
    %26 = arith.subf %24, %25 : vector<8x128xf32>
    %27 = arith.mulf %26, %26 : vector<8x128xf32>
    %cst_20 = arith.constant dense<0.000000e+00> : vector<8x128xf32>
    %28 = tpu.matmul %27, %1, %cst_20 {dimension_numbers = #tpu.dot_dimension_numbers<[1], [0], [0], [1], [0, 0, 1, 1], [], []>} : vector<8x128xf32>, vector<128x128xf32>, vector<8x128xf32> -> vector<8x128xf32>
    %cst_21 = arith.constant 9.99999974E-6 : f32
    %29 = vector.broadcast %cst_21 : f32 to vector<8x128xf32>
    %30 = arith.addf %28, %29 : vector<8x128xf32>
    %31 = math.rsqrt %30 : vector<8x128xf32>
    %32 = arith.mulf %26, %31 : vector<8x128xf32>
    %33 = vector.broadcast %3 : vector<1x128xf32> to vector<8x128xf32>
    %34 = arith.mulf %32, %33 : vector<8x128xf32>
    %35 = vector.broadcast %4 : vector<1x128xf32> to vector<8x128xf32>
    %36 = arith.addf %34, %35 : vector<8x128xf32>
    %37 = arith.addf %0, %36 : vector<8x128xf32>
    %c0_22 = arith.constant 0 : index
    %c0_23 = arith.constant 0 : index
    %38 = vector.load %arg3[%c0_22, %c0_23] : memref<128x256xf32, #tpu.memory_space<vmem>>, vector<128x256xf32>
    %cst_24 = arith.constant dense<0.000000e+00> : vector<8x256xf32>
    %39 = tpu.matmul %37, %38, %cst_24 {dimension_numbers = #tpu.dot_dimension_numbers<[1], [0], [0], [1], [0, 0, 1, 1], [], []>} : vector<8x128xf32>, vector<128x256xf32>, vector<8x256xf32> -> vector<8x256xf32>
    %40 = vector.broadcast %10 : vector<1x256xf32> to vector<8x256xf32>
    %41 = arith.addf %39, %40 : vector<8x256xf32>
    %cst_25 = arith.constant 5.000000e-01 : f32
    %42 = vector.broadcast %cst_25 : f32 to vector<8x256xf32>
    %43 = arith.mulf %42, %41 : vector<8x256xf32>
    %cst_26 = arith.constant 2.000000e+00 : f32
    %44 = math.sqrt %cst_26 : f32
    %cst_27 = arith.constant 1.000000e+00 : f32
    %45 = arith.divf %cst_27, %44 : f32
    %46 = vector.broadcast %45 : f32 to vector<8x256xf32>
    %47 = arith.mulf %41, %46 : vector<8x256xf32>
    %48 = math.erf %47 : vector<8x256xf32>
    %cst_28 = arith.constant 1.000000e+00 : f32
    %49 = vector.broadcast %cst_28 : f32 to vector<8x256xf32>
    %50 = arith.addf %49, %48 : vector<8x256xf32>
    %51 = arith.mulf %43, %50 : vector<8x256xf32>
    %c0_29 = arith.constant 0 : index
    %c0_30 = arith.constant 0 : index
    %52 = vector.load %arg4[%c0_29, %c0_30] : memref<256x128xf32, #tpu.memory_space<vmem>>, vector<256x128xf32>
    %cst_31 = arith.constant dense<0.000000e+00> : vector<8x128xf32>
    %53 = tpu.matmul %51, %52, %cst_31 {dimension_numbers = #tpu.dot_dimension_numbers<[1], [0], [0], [1], [0, 0, 1, 1], [], []>} : vector<8x256xf32>, vector<256x128xf32>, vector<8x128xf32> -> vector<8x128xf32>
    %54 = vector.broadcast %5 : vector<1x128xf32> to vector<8x128xf32>
    %55 = arith.addf %53, %54 : vector<8x128xf32>
    %cst_32 = arith.constant dense<0.000000e+00> : vector<8x128xf32>
    %56 = tpu.matmul %55, %1, %cst_32 {dimension_numbers = #tpu.dot_dimension_numbers<[1], [0], [0], [1], [0, 0, 1, 1], [], []>} : vector<8x128xf32>, vector<128x128xf32>, vector<8x128xf32> -> vector<8x128xf32>
    %57 = arith.subf %55, %56 : vector<8x128xf32>
    %58 = arith.mulf %57, %57 : vector<8x128xf32>
    %cst_33 = arith.constant dense<0.000000e+00> : vector<8x128xf32>
    %59 = tpu.matmul %58, %1, %cst_33 {dimension_numbers = #tpu.dot_dimension_numbers<[1], [0], [0], [1], [0, 0, 1, 1], [], []>} : vector<8x128xf32>, vector<128x128xf32>, vector<8x128xf32> -> vector<8x128xf32>
    %cst_34 = arith.constant 9.99999974E-6 : f32
    %60 = vector.broadcast %cst_34 : f32 to vector<8x128xf32>
    %61 = arith.addf %59, %60 : vector<8x128xf32>
    %62 = math.rsqrt %61 : vector<8x128xf32>
    %63 = arith.mulf %57, %62 : vector<8x128xf32>
    %64 = vector.broadcast %6 : vector<1x128xf32> to vector<8x128xf32>
    %65 = arith.mulf %63, %64 : vector<8x128xf32>
    %66 = vector.broadcast %7 : vector<1x128xf32> to vector<8x128xf32>
    %67 = arith.addf %65, %66 : vector<8x128xf32>
    %cst_35 = arith.constant dense<0.000000e+00> : vector<8x128xf32>
    %68 = tpu.matmul %67, %1, %cst_35 {dimension_numbers = #tpu.dot_dimension_numbers<[1], [0], [0], [1], [0, 0, 1, 1], [], []>} : vector<8x128xf32>, vector<128x128xf32>, vector<8x128xf32> -> vector<8x128xf32>
    %69 = arith.subf %67, %68 : vector<8x128xf32>
    %70 = arith.mulf %69, %69 : vector<8x128xf32>
    %cst_36 = arith.constant dense<0.000000e+00> : vector<8x128xf32>
    %71 = tpu.matmul %70, %1, %cst_36 {dimension_numbers = #tpu.dot_dimension_numbers<[1], [0], [0], [1], [0, 0, 1, 1], [], []>} : vector<8x128xf32>, vector<128x128xf32>, vector<8x128xf32> -> vector<8x128xf32>
    %cst_37 = arith.constant 9.99999974E-6 : f32
    %72 = vector.broadcast %cst_37 : f32 to vector<8x128xf32>
    %73 = arith.addf %71, %72 : vector<8x128xf32>
    %74 = math.rsqrt %73 : vector<8x128xf32>
    %75 = arith.mulf %69, %74 : vector<8x128xf32>
    %76 = vector.broadcast %8 : vector<1x128xf32> to vector<8x128xf32>
    %77 = arith.mulf %75, %76 : vector<8x128xf32>
    %78 = vector.broadcast %9 : vector<1x128xf32> to vector<8x128xf32>
    %79 = arith.addf %77, %78 : vector<8x128xf32>
    %80 = arith.addf %37, %79 : vector<8x128xf32>
    %c0_38 = arith.constant 0 : index
    %c0_39 = arith.constant 0 : index
    %81 = vector.load %arg7[%c0_38, %c0_39] : memref<8x128xf32, #tpu.memory_space<vmem>>, vector<8x128xf32>
    tpu.vector_store %arg7[%c0_38, %c0_39], %80 {strides = array<i32>} : memref<8x128xf32, #tpu.memory_space<vmem>>, vector<8x128xf32>,
    return
  }
  func.func @transform_0(%arg0: i32) -> (i32, i32) {
    %c0_i32 = arith.constant 0 : i32
    %c0_i32_0 = arith.constant 0 : i32
    return %arg0, %c0_i32 : i32, i32
  }
  func.func @transform_1(%arg0: i32) -> (i32, i32) {
    %c0_i32 = arith.constant 0 : i32
    %c0_i32_0 = arith.constant 0 : i32
    %c0_i32_1 = arith.constant 0 : i32
    return %c0_i32, %c0_i32_0 : i32, i32
  }
  func.func @transform_2(%arg0: i32) -> (i32, i32) {
    %c0_i32 = arith.constant 0 : i32
    %c0_i32_0 = arith.constant 0 : i32
    %c0_i32_1 = arith.constant 0 : i32
    return %c0_i32, %c0_i32_0 : i32, i32
  }
  func.func @transform_3(%arg0: i32) -> (i32, i32) {
    %c0_i32 = arith.constant 0 : i32
    %c0_i32_0 = arith.constant 0 : i32
    %c0_i32_1 = arith.constant 0 : i32
    return %c0_i32, %c0_i32_0 : i32, i32
  }
  func.func @transform_4(%arg0: i32) -> (i32, i32) {
    %c0_i32 = arith.constant 0 : i32
    %c0_i32_0 = arith.constant 0 : i32
    %c0_i32_1 = arith.constant 0 : i32
    return %c0_i32, %c0_i32_0 : i32, i32
  }
  func.func @transform_5(%arg0: i32) -> (i32, i32) {
    %c0_i32 = arith.constant 0 : i32
    %c0_i32_0 = arith.constant 0 : i32
    %c0_i32_1 = arith.constant 0 : i32
    return %c0_i32, %c0_i32_0 : i32, i32
  }
  func.func @transform_6(%arg0: i32) -> (i32, i32) {
    %c0_i32 = arith.constant 0 : i32
    %c0_i32_0 = arith.constant 0 : i32
    return %arg0, %c0_i32 : i32, i32
  }
}

</mosaic_0001>

<bundles_post_ra>
// kernel: tpu_custom_call.1
= control target key start
LH: loop header
LB: loop body
LE: loop exit
PB: predicated region body
PF: predicated region fallthrough
CT: control target
= control target key end

     0   :  { %11 = vsyncpa [#allocation3], 0  ;;  %s2031_s0 = inlined_call_operand.hbm [shape: f32[8,128], index: 0, kind: input, shape index: {}]   ;;  %s2032_s1 = inlined_call_operand.hbm [shape: f32[128,128], index: 1, kind: input, shape index: {}]   ;;  %s2033_s2 = inlined_call_operand.hbm [shape: f32[128,256], index: 2, kind: input, shape index: {}]   ;;  %s2034_s3 = inlined_call_operand.hbm [shape: f32[256,128], index: 3, kind: input, shape index: {}]   ;;  %s2035_s4 = inlined_call_operand.hbm [shape: f32[128,128], index: 4, kind: input, shape index: {}]   ;;  %s2036_s5 = inlined_call_operand.hbm [shape: f32[9,256], index: 5, kind: input, shape index: {}]   ;;  %s2037_s6 = inlined_call_operand.hbm [shape: f32[8,128], index: 6, kind: output, shape index: {}]  }
   0x1   :  { %12 = vsyncpa [#allocation6], 0 }
   0x2   :  { %13 = vsyncpa [#allocation9], 0 }
   0x3   :  { %14 = vsyncpa [#allocation12], 0 }
   0x4   :  { %15 = vsyncpa [#allocation4], 0  ;;  %s1728_s21 = smov [#allocation5]   ;;  %s1564_s25 = scalar_lea.hbm %s2032_s1, 2048 }
   0x5   :  { %s31_s22 = sshll.u32 %s1728_s21, 4  ;;  %p1565_p0 = scmp.ne.s32.totalorder %s2032_s1, %s1564_s25  ;;  %s32_s22 = int_to_ptr.vmem [resolvable:$true] %s31_s22 }
   0x6   :  { %p1568_p1 = scmp.lt.u32.totalorder %s1564_s25, %s2032_s1 }
   0x8   :  { %p1570_p2 = pnand %p1568_p1, %p1565_p0 }
   0xa   :  { %1573 = shalt.err (!%p1570_p2)
}
   0xb   :  { %s1574_s30 = scalar_lea.vmem %s32_s22, 2048  ;;  %p1579_p4 = scmp.lt.s32.totalorder %s32_s22, %s32_s22 }
   0xc   :  { %p1575_p3 = scmp.ne.s32.totalorder %s32_s22, %s1574_s30  ;;  %p1580_p5 = scmp.lt.s32.totalorder %s1574_s30, %s1574_s30 }
   0xe   :  { %p1581_p6 = por %p1580_p5, %p1579_p4 }
  0x10   :  { %p1582_p7 = pnand %p1581_p6, %p1575_p3 }
  0x12   :  { %1585 = shalt.err (!%p1582_p7)
}
  0x13   :  { %s1729_s7 = smov 128   ;;  %s1730_s8 = smov 8  }
  0x14   :  { %37 = dma.hbm_to_vmem [thread:$0]  %s2032_s1, 2048, %s32_s22, [#allocation6], %s1729_s7, %s1729_s7, %s1730_s8  }
  0x15   :  { %s1731_s11 = smov [#allocation8]   ;;  %s1732_s13 = smov [#allocation2]  }
  0x16   :  { %s55_s12 = sshll.u32 %s1731_s11, 4  ;;  %s22_s14 = sshll.u32 %s1732_s13, 4  ;;  %s56_s12 = int_to_ptr.vmem [resolvable:$true] %s55_s12  ;;  %s23_s14 = int_to_ptr.vmem [resolvable:$true] %s22_s14 }
  0x17   :  { %s1586_s17 = scalar_lea.hbm %s2034_s3, 4096 }
  0x18   :  { %p1587_p8 = scmp.ne.s32.totalorder %s2034_s3, %s1586_s17  ;;  %p1590_p9 = scmp.lt.u32.totalorder %s1586_s17, %s2034_s3 }
  0x1a   :  { %p1592_p10 = pnand %p1590_p9, %p1587_p8 }
  0x1c   :  { %1595 = shalt.err (!%p1592_p10)
}
  0x1d   :  { %s1596_s1 = scalar_lea.vmem %s56_s12, 4096  ;;  %p1601_p12 = scmp.lt.s32.totalorder %s56_s12, %s56_s12 }
  0x1e   :  { %p1597_p11 = scmp.ne.s32.totalorder %s56_s12, %s1596_s1  ;;  %p1602_p13 = scmp.lt.s32.totalorder %s1596_s1, %s1596_s1 }
  0x20   :  { %p1603_p0 = por %p1602_p13, %p1601_p12 }
  0x22   :  { %p1604_p1 = pnand %p1603_p0, %p1597_p11 }
  0x24   :  { %1607 = shalt.err (!%p1604_p1)
}
  0x25   :  { %61 = dma.hbm_to_vmem [thread:$0]  %s2034_s3, 4096, %s56_s12, [#allocation9], %s1729_s7, %s1729_s7, %s1730_s8  }
  0x26   :  { %s1608_s26 = scalar_lea.hbm %s2031_s0, 128 }
  0x27   :  { %p1609_p2 = scmp.ne.s32.totalorder %s2031_s0, %s1608_s26  ;;  %p1612_p3 = scmp.lt.u32.totalorder %s1608_s26, %s2031_s0 }
  0x29   :  { %p1614_p4 = pnand %p1612_p3, %p1609_p2 }
  0x2b   :  { %1617 = shalt.err (!%p1614_p4)
}
  0x2c   :  { %s1618_s9 = scalar_lea.vmem %s23_s14, 128  ;;  %p1623_p6 = scmp.lt.s32.totalorder %s23_s14, %s23_s14 }
  0x2d   :  { %p1619_p5 = scmp.ne.s32.totalorder %s23_s14, %s1618_s9  ;;  %p1624_p7 = scmp.lt.s32.totalorder %s1618_s9, %s1618_s9 }
  0x2f   :  { %p1625_p8 = por %p1624_p7, %p1623_p6 }
  0x31   :  { %p1626_p9 = pnand %p1625_p8, %p1619_p5 }
  0x33   :  { %1629 = shalt.err (!%p1626_p9)
}
  0x34   :  { %25 = dma.hbm_to_vmem [thread:$0]  %s2031_s0, 128, %s23_s14, [#allocation3]  }
  0x35   :  { %s1733_s11 = smov [#allocation7]   ;;  %s1630_s16 = scalar_lea.hbm %s2033_s2, 4096 }
  0x36   :  { %s43_s12 = sshll.u32 %s1733_s11, 4  ;;  %p1631_p10 = scmp.ne.s32.totalorder %s2033_s2, %s1630_s16  ;;  %s44_s12 = int_to_ptr.vmem [resolvable:$true] %s43_s12 }
  0x37   :  { %p1634_p11 = scmp.lt.u32.totalorder %s1630_s16, %s2033_s2 }
  0x39   :  { %p1636_p12 = pnand %p1634_p11, %p1631_p10 }
  0x3b   :  { %1639 = shalt.err (!%p1636_p12)
}
  0x3c   :  { %s1640_s21 = scalar_lea.vmem %s44_s12, 4096  ;;  %p1645_p0 = scmp.lt.s32.totalorder %s44_s12, %s44_s12 }
  0x3d   :  { %p1641_p13 = scmp.ne.s32.totalorder %s44_s12, %s1640_s21  ;;  %p1646_p1 = scmp.lt.s32.totalorder %s1640_s21, %s1640_s21 }
  0x3f   :  { %p1647_p2 = por %p1646_p1, %p1645_p0 }
  0x41   :  { %p1648_p3 = pnand %p1647_p2, %p1641_p13 }
  0x43   :  { %1651 = shalt.err (!%p1648_p3)
}
  0x44   :  { %s1734_s0 = smov 256   ;;  %s1735_s14 = smov 16  }
  0x45   :  { %49 = dma.hbm_to_vmem [thread:$0]  %s2033_s2, 4096, %s44_s12, [#allocation6], %s1734_s0, %s1734_s0, %s1735_s14  }
  0x46   :  { %s1736_s23 = smov [#allocation10]   ;;  %s1737_s25 = smov [#allocation11]  }
  0x47   :  { %s67_s24 = sshll.u32 %s1736_s23, 4  ;;  %s79_s26 = sshll.u32 %s1737_s25, 4  ;;  %s68_s24 = int_to_ptr.vmem [resolvable:$true] %s67_s24  ;;  %s1834_s26 = int_to_ptr.vmem [resolvable:$true] %s79_s26 }
  0x48   :  { %s1652_s29 = scalar_lea.hbm %s2035_s4, 2048 }
  0x49   :  { %p1653_p4 = scmp.ne.s32.totalorder %s2035_s4, %s1652_s29  ;;  %p1656_p5 = scmp.lt.u32.totalorder %s1652_s29, %s2035_s4 }
  0x4b   :  { %p1658_p6 = pnand %p1656_p5, %p1653_p4 }
  0x4d   :  { %1661 = shalt.err (!%p1658_p6)
}
  0x4e   :  { %s1662_s2 = scalar_lea.vmem %s68_s24, 2048  ;;  %p1667_p8 = scmp.lt.s32.totalorder %s68_s24, %s68_s24 }
  0x4f   :  { %p1663_p7 = scmp.ne.s32.totalorder %s68_s24, %s1662_s2  ;;  %p1668_p9 = scmp.lt.s32.totalorder %s1662_s2, %s1662_s2 }
  0x51   :  { %p1669_p10 = por %p1668_p9, %p1667_p8 }
  0x53   :  { %p1670_p11 = pnand %p1669_p10, %p1663_p7 }
  0x55   :  { %1673 = shalt.err (!%p1670_p11)
}
  0x56   :  { %73 = dma.hbm_to_vmem [thread:$0]  %s2035_s4, 2048, %s68_s24, [#allocation9], %s1729_s7, %s1729_s7, %s1730_s8  }
  0x57   :  { %s1674_s16 = scalar_lea.hbm %s2036_s5, 512 }
  0x58   :  { %p1675_p12 = scmp.ne.s32.totalorder %s2036_s5, %s1674_s16  ;;  %p1678_p13 = scmp.lt.u32.totalorder %s1674_s16, %s2036_s5 }
  0x5a   :  { %p1680_p0 = pnand %p1678_p13, %p1675_p12 }
  0x5c   :  { %1683 = shalt.err (!%p1680_p0)
}
  0x5d   :  { %s1684_s21 = scalar_lea.vmem %s1834_s26, 512  ;;  %p1689_p2 = scmp.lt.s32.totalorder %s1834_s26, %s1834_s26 }
  0x5e   :  { %p1685_p1 = scmp.ne.s32.totalorder %s1834_s26, %s1684_s21  ;;  %p1690_p3 = scmp.lt.s32.totalorder %s1684_s21, %s1684_s21 }
  0x60   :  { %p1691_p4 = por %p1690_p3, %p1689_p2 }
  0x62   :  { %p1692_p5 = pnand %p1691_p4, %p1685_p1 }
  0x64   :  { %1695 = shalt.err (!%p1692_p5)
}
  0x65   :  { %85 = dma.hbm_to_vmem [thread:$0]  %s2036_s5, 512, %s1834_s26, [#allocation12], %s1734_s0, %s1734_s0, %s1735_s14  }
  0x66   :  { %1718 = dma.done.wait [#allocation3], 128  }
  0x67   :  { %1719 = vsyncadd [#allocation3], 4294967168 }
  0x68   :  { %1720 = dma.done.wait [#allocation6], 6144  }
  0x69   :  { %1721 = vsyncadd [#allocation6], 4294961152 }
  0x6a   :  { %1722 = dma.done.wait [#allocation9], 6144  }
  0x6b   :  { %1723 = vsyncadd [#allocation9], 4294961152 }
  0x6c   :  { %1724 = dma.done.wait [#allocation12], 512  }
  0x6d   :  { %1725 = vsyncadd [#allocation12], 4294966784  ;;  %v1738_v0 = vmov 0.0|0.0   ;;  %vm1739_vm0 = vmmov 0   ;;  %v1740_v1 = vmov 0.0   ;;  %v131_v2 = vld [vmem:[#allocation5] sm:$0xff] }
  0x6e   :  { %1306 = vmatprep.subr.bf16.mxu0 %v1738_v0  ;;  %1093 = vmatprep.mubr.msk.f32.mxu0 %vm1739_vm0, %v1740_v1  ;;  %v132_v3 = vld [vmem:[#allocation5 + $0x8] sm:$0xff]  ;;  %v133_v4 = vld [vmem:[#allocation5 + $0x10] sm:$0xff]  ;;  %v134_v6 = vld [vmem:[#allocation5 + $0x18] sm:$0xff]  ;;  %s1741_s5 = smov [#allocation13]  }
  0x6f   :  { %1330 = vmatprep.subr.bf16.mxu1 %v1738_v0  ;;  %1128 = vmatprep.mubr.msk.f32.mxu1 %vm1739_vm0, %v1740_v1  ;;  %v1307_v5 = vpack.c.bf16 %v132_v3, %v131_v2  ;;  %v1310_v7 = vpack.c.bf16 %v134_v6, %v133_v4  ;;  %v135_v8 = vld [vmem:[#allocation5 + $0x20] sm:$0xff]  ;;  %v136_v9 = vld [vmem:[#allocation5 + $0x28] sm:$0xff]  ;;  %v107_v12 = vld [vmem:[#allocation10 + $0x10] sm:$0xff]  ;;  %s895_s8 = sshll.u32 %s1741_s5, 4  ;;  %s896_s8 = int_to_ptr.vmem [resolvable:$true] %s895_s8 }
  0x70   :  { %v105_v10 = vld [vmem:[#allocation10] sm:$0xff]  ;;  %v106_v11 = vld [vmem:[#allocation10 + $0x8] sm:$0xff]  ;;  %v108_v13 = vld [vmem:[#allocation10 + $0x18] sm:$0xff]  ;;  %v1313_v14 = vpack.c.bf16 %v136_v9, %v135_v8  ;;  %s1696_s0 = scalar_lea.vmem %s896_s8, 128  ;;  %p1701_p7 = scmp.lt.s32.totalorder %s896_s8, %s896_s8 }
  0x71   :  { %1308 = vmatpush3.bf16.msra.mxu0 %v1307_v5  ;;  %v1878_v15 = vpack.c.bf16 %v106_v11, %v105_v10  ;;  %v137_v16 = vld [vmem:[#allocation5 + $0x30] sm:$0xff]  ;;  %v138_v17 = vld [vmem:[#allocation5 + $0x38] sm:$0xff]  ;;  %v1882_v18 = vpack.c.bf16 %v108_v13, %v107_v12  ;;  %v109_v19 = vld [vmem:[#allocation10 + $0x20] sm:$0xff]  ;;  %p1697_p6 = scmp.ne.s32.totalorder %s896_s8, %s1696_s0  ;;  %p1702_p8 = scmp.lt.s32.totalorder %s1696_s0, %s1696_s0 }
  0x72   :  { %1309 = vmatprep.subr.bf16.mxu0 %v1738_v0  ;;  %v110_v20 = vld [vmem:[#allocation10 + $0x28] sm:$0xff]  ;;  %v1316_v21 = vpack.c.bf16 %v138_v17, %v137_v16  ;;  %v139_v22 = vld [vmem:[#allocation5 + $0x40] sm:$0xff]  ;;  %v141_v26 = vld [vmem:[#allocation5 + $0x50] sm:$0xff] }
  0x73   :  { %1332 = vmatpush3.bf16.msra.mxu1 %v1878_v15  ;;  %v140_v23 = vld [vmem:[#allocation5 + $0x48] sm:$0xff]  ;;  %v1887_v24 = vpack.c.bf16 %v110_v20, %v109_v19  ;;  %v142_v27 = vld [vmem:[#allocation5 + $0x58] sm:$0xff]  ;;  %v143_v29 = vld [vmem:[#allocation5 + $0x60] sm:$0xff]  ;;  %p1703_p9 = por %p1702_p8, %p1701_p7 }
  0x74   :  { %1333 = vmatprep.subr.bf16.mxu1 %v1738_v0  ;;  %v1319_v25 = vpack.c.bf16 %v140_v23, %v139_v22  ;;  %v1322_v28 = vpack.c.bf16 %v142_v27, %v141_v26  ;;  %v144_v30 = vld [vmem:[#allocation5 + $0x68] sm:$0xff]  ;;  %v145_v32 = vld [vmem:[#allocation5 + $0x70] sm:$0xff]  ;;  %v146_v33 = vld [vmem:[#allocation5 + $0x78] sm:$0xff] }
  0x75   :  { %1311 = vmatpush3.bf16.msra.mxu0 %v1310_v7  ;;  %v1325_v31 = vpack.c.bf16 %v144_v30, %v143_v29  ;;  %v1328_v34 = vpack.c.bf16 %v146_v33, %v145_v32  ;;  %v1896_v35 = vld [vmem:[#allocation2] sm:$0xff]  ;;  %v111_v36 = vld [vmem:[#allocation10 + $0x30] sm:$0xff]  ;;  %v113_v39 = vld [vmem:[#allocation10 + $0x40] sm:$0xff]  ;;  %p1704_p10 = pnand %p1703_p9, %p1697_p6 }
  0x76   :  { %1312 = vmatprep.subr.bf16.mxu0 %v1738_v0  ;;  %v112_v37 = vld [vmem:[#allocation10 + $0x38] sm:$0xff]  ;;  %v114_v40 = vld [vmem:[#allocation10 + $0x48] sm:$0xff]  ;;  %v115_v42 = vld [vmem:[#allocation10 + $0x50] sm:$0xff] }
  0x77   :  { %1335 = vmatpush3.bf16.msra.mxu1 %v1882_v18  ;;  %v1908_v38 = vpack.c.bf16 %v112_v37, %v111_v36  ;;  %v1914_v41 = vpack.c.bf16 %v114_v40, %v113_v39  ;;  %v116_v43 = vld [vmem:[#allocation10 + $0x58] sm:$0xff]  ;;  %v117_v45 = vld [vmem:[#allocation10 + $0x60] sm:$0xff]  ;;  %v118_v46 = vld [vmem:[#allocation10 + $0x68] sm:$0xff] }
  0x78   :  { %1336 = vmatprep.subr.bf16.mxu1 %v1738_v0  ;;  %v1920_v44 = vpack.c.bf16 %v116_v43, %v115_v42  ;;  %v1926_v47 = vpack.c.bf16 %v118_v46, %v117_v45  ;;  %v119_v48 = vld [vmem:[#allocation10 + $0x70] sm:$0xff]  ;;  %v120_v49 = vld [vmem:[#allocation10 + $0x78] sm:$0xff]  ;;  %v121_v51 = vld [vmem:[#allocation11] ss:$0 sm:$0xff] }
  0x79   :  { %1314 = vmatpush3.bf16.msra.mxu0 %v1313_v14  ;;  %v1932_v50 = vpack.c.bf16 %v120_v49, %v119_v48  ;;  %v370_v60 = vld [vmem:[#allocation7 + $0x8] sm:$0xff]  ;;  %v372_v61 = vld [vmem:[#allocation7 + $0x18] sm:$0xff]  ;;  %v369_v62 = vld [vmem:[#allocation7] sm:$0xff] }
  0x7a   :  { %1315 = vmatprep.subr.bf16.mxu0 %v1738_v0  ;;  %v1378_v63 = vpack.c.bf16 %v372_v61, %v370_v60  ;;  %v371_v2 = vld [vmem:[#allocation7 + $0x10] sm:$0xff]  ;;  %v374_v3 = vld [vmem:[#allocation7 + $0x28] sm:$0xff]  ;;  %v376_v4 = vld [vmem:[#allocation7 + $0x38] sm:$0xff] }
  0x7b   :  { %1338 = vmatpush3.bf16.msra.mxu1 %v1887_v24  ;;  %v1380_v5 = vpack.c.bf16 %v371_v2, %v369_v62  ;;  %v1382_v6 = vpack.c.bf16 %v376_v4, %v374_v3  ;;  %v373_v7 = vld [vmem:[#allocation7 + $0x20] sm:$0xff]  ;;  %v375_v8 = vld [vmem:[#allocation7 + $0x30] sm:$0xff]  ;;  %v378_v9 = vld [vmem:[#allocation7 + $0x48] sm:$0xff] }
  0x7c   :  { %1339 = vmatprep.subr.bf16.mxu1 %v1738_v0  ;;  %v380_v10 = vld [vmem:[#allocation7 + $0x58] sm:$0xff]  ;;  %v1384_v11 = vpack.c.bf16 %v375_v8, %v373_v7  ;;  %v377_v13 = vld [vmem:[#allocation7 + $0x40] sm:$0xff]  ;;  %v379_v14 = vld [vmem:[#allocation7 + $0x50] sm:$0xff] }
  0x7d   :  { %1317 = vmatpush3.bf16.msra.mxu0 %v1316_v21  ;;  %v1386_v12 = vpack.c.bf16 %v380_v10, %v378_v9  ;;  %v1388_v16 = vpack.c.bf16 %v379_v14, %v377_v13  ;;  %v382_v22 = vld [vmem:[#allocation7 + $0x68] sm:$0xff]  ;;  %v384_v23 = vld [vmem:[#allocation7 + $0x78] sm:$0xff]  ;;  %v381_v26 = vld [vmem:[#allocation7 + $0x60] sm:$0xff] }
  0x7e   :  { %1318 = vmatprep.subr.bf16.mxu0 %v1738_v0  ;;  %v383_v27 = vld [vmem:[#allocation7 + $0x70] sm:$0xff]  ;;  %v386_v29 = vld [vmem:[#allocation7 + $0x88] sm:$0xff]  ;;  %v388_v30 = vld [vmem:[#allocation7 + $0x98] sm:$0xff] }
  0x7f   :  { %1341 = vmatpush3.bf16.msra.mxu1 %v1908_v38  ;;  %v385_v32 = vld [vmem:[#allocation7 + $0x80] sm:$0xff]  ;;  %v387_v33 = vld [vmem:[#allocation7 + $0x90] sm:$0xff]  ;;  %v390_v36 = vld [vmem:[#allocation7 + $0xa8] sm:$0xff] }
  0x80   :  { %1342 = vmatprep.subr.bf16.mxu1 %v1738_v0  ;;  %v392_v37 = vld [vmem:[#allocation7 + $0xb8] sm:$0xff]  ;;  %v389_v40 = vld [vmem:[#allocation7 + $0xa0] sm:$0xff]  ;;  %v391_v42 = vld [vmem:[#allocation7 + $0xb0] sm:$0xff] }
  0x81   :  { %1320 = vmatpush3.bf16.msra.mxu0 %v1319_v25  ;;  %v1390_v25 = vpack.c.bf16 %v384_v23, %v382_v22  ;;  %v1398_v39 = vpack.c.bf16 %v392_v37, %v390_v36  ;;  %v1400_v43 = vpack.c.bf16 %v391_v42, %v389_v40  ;;  %v394_v45 = vld [vmem:[#allocation7 + $0xc8] sm:$0xff]  ;;  %v396_v46 = vld [vmem:[#allocation7 + $0xd8] sm:$0xff]  ;;  %v393_v49 = vld [vmem:[#allocation7 + $0xc0] sm:$0xff] }
  0x82   :  { %1321 = vmatprep.subr.bf16.mxu0 %v1738_v0  ;;  %v1402_v48 = vpack.c.bf16 %v396_v46, %v394_v45  ;;  %v510_v60 = vld [vmem:[#allocation8 + $0x88] sm:$0xff]  ;;  %v493_v61 = vld [vmem:[#allocation8] sm:$0xff]  ;;  %v511_v2 = vld [vmem:[#allocation8 + $0x90] sm:$0xff] }
  0x83   :  { %1344 = vmatpush3.bf16.msra.mxu1 %v1914_v41  ;;  %v512_v3 = vld [vmem:[#allocation8 + $0x98] sm:$0xff]  ;;  %v513_v8 = vld [vmem:[#allocation8 + $0xa0] sm:$0xff]  ;;  %v514_v9 = vld [vmem:[#allocation8 + $0xa8] sm:$0xff] }
  0x84   :  { %1345 = vmatprep.subr.bf16.mxu1 %v1738_v0  ;;  %v496_v7 = vld [vmem:[#allocation8 + $0x18] sm:$0xff]  ;;  %v498_v13 = vld [vmem:[#allocation8 + $0x28] sm:$0xff]  ;;  %v122_v22 = vld [vmem:[#allocation11 + $0x1] ss:$0 sm:$0xff] }
  0x85   :  { %1323 = vmatpush3.bf16.msra.mxu0 %v1322_v28  ;;  %v1392_v28 = vpack.c.bf16 %v383_v27, %v381_v26  ;;  %v501_v37 = vld [vmem:[#allocation8 + $0x40] sm:$0xff]  ;;  %v519_v42 = vld [vmem:[#allocation8 + $0xd0] sm:$0xff] }
  0x86   :  { %1324 = vmatprep.subr.bf16.mxu0 %v1738_v0  ;;  %v503_v46 = vld [vmem:[#allocation8 + $0x50] sm:$0xff] }
  0x87   :  { %1347 = vmatpush3.bf16.msra.mxu1 %v1920_v44 }
  0x88   :  { %1348 = vmatprep.subr.bf16.mxu1 %v1738_v0 }
  0x89   :  { %1326 = vmatpush3.bf16.msra.mxu0 %v1325_v31  ;;  %v1394_v31 = vpack.c.bf16 %v388_v30, %v386_v29  ;;  %v499_v30 = vld [vmem:[#allocation8 + $0x30] sm:$0xff] }
  0x8a   :  { %1327 = vmatprep.subr.bf16.mxu0 %v1738_v0 }
  0x8b   :  { %1350 = vmatpush3.bf16.msra.mxu1 %v1926_v47 }
  0x8c   :  { %1351 = vmatprep.subr.bf16.mxu1 %v1738_v0 }
  0x8d   :  { %1329 = vmatpush3.bf16.msra.mxu0 %v1328_v34  ;;  %v1396_v34 = vpack.c.bf16 %v387_v33, %v385_v32  ;;  %v517_v33 = vld [vmem:[#allocation8 + $0xc0] sm:$0xff] }
  0x8e   :  { %1354 = vmatprep.subr.bf16.mxu0 %v1738_v0 }
  0x8f   :  { %1353 = vmatpush3.bf16.msra.mxu1 %v1932_v50 }
  0x90   :  { %1094 = vmatmul.mubr.f32.vlgmr.msra.gmra.mrb[0].mxu0 %v1896_v35  ;;  %1379 = vmatprep.subr.bf16.mxu1 %v1378_v63  ;;  %v494_v63 = vld [vmem:[#allocation8 + $0x8] sm:$0xff] }
  0x91   :  { %1356 = vmatpush3.bf16.msra.mxu0 %v1878_v15  ;;  %1163 = vmatprep.mubr.msk.f32.mxu0 %vm1739_vm0, %v1740_v1  ;;  %v1412_v4 = vpack.c.bf16 %v494_v63, %v493_v61  ;;  %v508_v61 = vld [vmem:[#allocation8 + $0x78] sm:$0xff]  ;;  %v402_v63 = vlaneseq }
  0x92   :  { %1357 = vmatprep.subr.bf16.mxu0 %v1738_v0 }
  0x95   :  { %1359 = vmatpush3.bf16.msra.mxu0 %v1882_v18 }
  0x96   :  { %1360 = vmatprep.subr.bf16.mxu0 %v1738_v0 }
  0x99   :  { %1362 = vmatpush3.bf16.msra.mxu0 %v1887_v24 }
  0x9a   :  { %1363 = vmatprep.subr.bf16.mxu0 %v1738_v0 }
  0x9d   :  { %1365 = vmatpush3.bf16.msra.mxu0 %v1908_v38 }
  0x9e   :  { %1366 = vmatprep.subr.bf16.mxu0 %v1738_v0 }
  0xa1   :  { %1368 = vmatpush3.bf16.msra.mxu0 %v1914_v41 }
  0xa2   :  { %1369 = vmatprep.subr.bf16.mxu0 %v1738_v0 }
  0xa5   :  { %1371 = vmatpush3.bf16.msra.mxu0 %v1920_v44 }
  0xa6   :  { %1372 = vmatprep.subr.bf16.mxu0 %v1738_v0 }
  0xa9   :  { %1374 = vmatpush3.bf16.msra.mxu0 %v1926_v47 }
  0xaa   :  { %1375 = vmatprep.subr.bf16.mxu0 %v1738_v0 }
  0xad   :  { %1377 = vmatpush3.bf16.msra.mxu0 %v1932_v50 }
 0x163   :  { %v213_v52 = vpop.f32.mrb[0].mxu0 }
 0x164   :  { %v214_v53 = vadd.f32 %v213_v52, %v121_v51  ;;  %v1095_v54 = vpop.f32.mrb[1].mxu0  ;;  %v395_v51 = vld [vmem:[#allocation7 + $0xd0] sm:$0xff] }
 0x165   :  { %v1404_v52 = vpack.c.bf16 %v395_v51, %v393_v49  ;;  %v400_v54 = vld [vmem:[#allocation7 + $0xf8] sm:$0xff]  ;;  %v521_v51 = vld [vmem:[#allocation8 + $0xe0] sm:$0xff] }
 0x166   :  { %v218_v55 = vmul.f32 0.70710677, %v214_v53  ;;  %v217_v57 = vmul.f32 0.5, %v214_v53  ;;  %v398_v53 = vld [vmem:[#allocation7 + $0xe8] sm:$0xff] }
 0x168   :  { %1552 = verf.f32 %v218_v55  ;;  %v397_v55 = vld [vmem:[#allocation7 + $0xe0] sm:$0xff] }
 0x172   :  { %v1553_v56 = vpop.eup %1552 }
 0x173   :  { %v220_v58 = vadd.f32 1.0, %v1553_v56  ;;  %v1406_v56 = vpack.c.bf16 %v400_v54, %v398_v53  ;;  %v505_v54 = vld [vmem:[#allocation8 + $0x60] sm:$0xff] }
 0x175   :  { %v221_v59 = vmul.f32 %v220_v58, %v217_v57  ;;  %v399_v57 = vld [vmem:[#allocation7 + $0xf0] sm:$0xff] }
 0x176   :  { %v1408_v58 = vpack.c.bf16 %v399_v57, %v397_v55  ;;  %v506_v55 = vld [vmem:[#allocation8 + $0x68] sm:$0xff]  ;;  %v523_v57 = vld [vmem:[#allocation8 + $0xf0] sm:$0xff] }
 0x177   :  { %1129 = vmatmul.mubr.f32.vlgmr.msra.gmra.mrb[0].mxu1 %v221_v59 }
 0x178   :  { %476 = vmatprep.mubr.f32.mxu1 %v1740_v1  ;;  %1381 = vmatpush1.bf16.msra.mxu1 %v1380_v5  ;;  %v1414_v5 = vpack.c.bf16 %v512_v3, %v511_v2  ;;  %v403_v2 = vshrl.u32 %v402_v63, 7 }
 0x179   :  { %1383 = vmatprep.subr.bf16.mxu1 %v1382_v6  ;;  %v495_v6 = vld [vmem:[#allocation8 + $0x10] sm:$0xff] }
 0x17a   :  { %v1416_v10 = vpack.c.bf16 %v496_v7, %v495_v6  ;;  %v404_v3 = vsub.s32 0, %v403_v2 }
 0x17c   :  { %1385 = vmatpush1.bf16.msra.mxu1 %v1384_v11  ;;  %v1418_v11 = vpack.c.bf16 %v514_v9, %v513_v8 }
 0x17d   :  { %1387 = vmatprep.subr.bf16.mxu1 %v1386_v12  ;;  %v497_v12 = vld [vmem:[#allocation8 + $0x20] sm:$0xff] }
 0x17e   :  { %v1420_v14 = vpack.c.bf16 %v498_v13, %v497_v12 }
 0x180   :  { %1389 = vmatpush1.bf16.msra.mxu1 %v1388_v16 }
 0x181   :  { %1391 = vmatprep.subr.bf16.mxu1 %v1390_v25  ;;  %v123_v25 = vld [vmem:[#allocation11 + $0x2] ss:$0 sm:$0xff] }
 0x184   :  { %1393 = vmatpush1.bf16.msra.mxu1 %v1392_v28 }
 0x185   :  { %1395 = vmatprep.subr.bf16.mxu1 %v1394_v31  ;;  %v500_v31 = vld [vmem:[#allocation8 + $0x38] sm:$0xff] }
 0x186   :  { %v1424_v32 = vpack.c.bf16 %v500_v31, %v499_v30 }
 0x188   :  { %1397 = vmatpush1.bf16.msra.mxu1 %v1396_v34  ;;  %v518_v34 = vld [vmem:[#allocation8 + $0xc8] sm:$0xff] }
 0x189   :  { %1399 = vmatprep.subr.bf16.mxu1 %v1398_v39  ;;  %v1426_v36 = vpack.c.bf16 %v518_v34, %v517_v33  ;;  %v502_v39 = vld [vmem:[#allocation8 + $0x48] sm:$0xff] }
 0x18a   :  { %v1428_v40 = vpack.c.bf16 %v502_v39, %v501_v37 }
 0x18c   :  { %1401 = vmatpush1.bf16.msra.mxu1 %v1400_v43  ;;  %v520_v43 = vld [vmem:[#allocation8 + $0xd8] sm:$0xff] }
 0x18d   :  { %1403 = vmatprep.subr.bf16.mxu1 %v1402_v48  ;;  %v1430_v45 = vpack.c.bf16 %v520_v43, %v519_v42  ;;  %v504_v48 = vld [vmem:[#allocation8 + $0x58] sm:$0xff] }
 0x18e   :  { %v1432_v49 = vpack.c.bf16 %v504_v48, %v503_v46  ;;  %v128_v48 = vld [vmem:[#allocation11 + $0x7] ss:$0 sm:$0xff] }
 0x190   :  { %1405 = vmatpush1.bf16.msra.mxu1 %v1404_v52  ;;  %v522_v52 = vld [vmem:[#allocation8 + $0xe8] sm:$0xff] }
 0x191   :  { %1407 = vmatprep.subr.bf16.mxu1 %v1406_v56  ;;  %v1434_v53 = vpack.c.bf16 %v522_v52, %v521_v51  ;;  %v1436_v56 = vpack.c.bf16 %v506_v55, %v505_v54 }
 0x194   :  { %1409 = vmatpush1.bf16.msra.mxu1 %v1408_v58  ;;  %v524_v58 = vld [vmem:[#allocation8 + $0xf8] sm:$0xff] }
 0x195   :  { %1442 = vmatprep.subr.bf16.mxu1 %v1738_v0 }
 0x24a   :  { %v288_v17 = vpop.f32.mrb[0].mxu1 }
 0x24b   :  { %v1937_v19 = vsub.f32 %v221_v59, %v288_v17  ;;  %v1130_v20 = vpop.f32.mrb[1].mxu1  ;;  %v509_v59 = vld [vmem:[#allocation8 + $0x80] sm:$0xff] }
 0x24c   :  { %v1410_v62 = vpack.c.bf16 %v510_v60, %v509_v59  ;;  %v1438_v59 = vpack.c.bf16 %v524_v58, %v523_v57  ;;  %v507_v60 = vld [vmem:[#allocation8 + $0x70] sm:$0xff] }
 0x24d   :  { %v293_v21 = vmul.f32 %v1937_v19, %v1937_v19 }
 0x24e   :  { %1411 = vmatprep.subr.bf16.mxu0 %v1410_v62  ;;  %v1440_v62 = vpack.c.bf16 %v508_v61, %v507_v60 }
 0x24f   :  { %1164 = vmatmul.mubr.f32.vlgmr.msra.gmra.mrb[2].mxu0 %v293_v21 }
 0x250   :  { %1413 = vmatpush3.bf16.msra.mxu0 %v1412_v4  ;;  %v130_v4 = vld [vmem:[#allocation11 + $0x10] ss:$8 sm:$0x3] }
 0x251   :  { %1415 = vmatprep.subr.bf16.mxu0 %v1414_v5  ;;  %v408_v5 = vsub.s32 1, %v403_v2  ;;  %v405_v6 = vrot.slane %v130_v4, %v404_v3 }
 0x253   :  { %v409_v7 = vrot.slane %v130_v4, %v408_v5 }
 0x254   :  { %1417 = vmatpush3.bf16.msra.mxu0 %v1416_v10 }
 0x255   :  { %1419 = vmatprep.subr.bf16.mxu0 %v1418_v11 }
 0x258   :  { %1421 = vmatpush3.bf16.msra.mxu0 %v1420_v14 }
 0x322   :  { %v360_v16 = vpop.f32.mrb[2].mxu0 }
 0x323   :  { %v361_v17 = vadd.f32 1e-05, %v360_v16  ;;  %v1165_v20 = vpop.f32.mrb[3].mxu0 }
 0x325   :  { %1554 = vrsqrt.f32 %v361_v17 }
 0x32f   :  { %v1555_v21 = vpop.eup %1554 }
 0x330   :  { %v365_v23 = vmul.f32 %v1555_v21, %v1937_v19  ;;  %v516_v19 = vld [vmem:[#allocation8 + $0xb8] sm:$0xff] }
 0x332   :  { %v366_v26 = vmul.f32 %v365_v23, %v122_v22 }
 0x334   :  { %v367_v27 = vadd.f32 %v366_v26, %v123_v25 }
 0x336   :  { %v1944_v28 = vadd.f32 %v367_v27, %v1896_v35  ;;  %v515_v35 = vld [vmem:[#allocation8 + $0xb0] sm:$0xff]  ;;  %v124_v27 = vld [vmem:[#allocation11 + $0x3] ss:$0 sm:$0xff] }
 0x337   :  { %v1422_v29 = vpack.c.bf16 %v516_v19, %v515_v35 }
 0x338   :  { %477 = vmatmul.mubr.f32.vlgmr.msra.gmra.mrb[2].mxu1 %v1944_v28 }
 0x339   :  { %1444 = vmatpush3.bf16.msra.mxu1 %v1878_v15  ;;  %1198 = vmatprep.mubr.msk.f32.mxu1 %vm1739_vm0, %v1740_v1 }
 0x33a   :  { %1445 = vmatprep.subr.bf16.mxu1 %v1738_v0  ;;  %1423 = vmatprep.subr.bf16.mxu0 %v1422_v29 }
 0x33b   :  { %1425 = vmatpush3.bf16.msra.mxu0 %v1424_v32 }
 0x33c   :  { %1427 = vmatprep.subr.bf16.mxu0 %v1426_v36 }
 0x33d   :  { %1447 = vmatpush3.bf16.msra.mxu1 %v1882_v18 }
 0x33e   :  { %1448 = vmatprep.subr.bf16.mxu1 %v1738_v0 }
 0x33f   :  { %1429 = vmatpush3.bf16.msra.mxu0 %v1428_v40 }
 0x340   :  { %1431 = vmatprep.subr.bf16.mxu0 %v1430_v45  ;;  %v127_v45 = vld [vmem:[#allocation11 + $0x6] ss:$0 sm:$0xff] }
 0x341   :  { %1450 = vmatpush3.bf16.msra.mxu1 %v1887_v24 }
 0x342   :  { %1451 = vmatprep.subr.bf16.mxu1 %v1738_v0 }
 0x343   :  { %1433 = vmatpush3.bf16.msra.mxu0 %v1432_v49 }
 0x344   :  { %1435 = vmatprep.subr.bf16.mxu0 %v1434_v53 }
 0x345   :  { %1453 = vmatpush3.bf16.msra.mxu1 %v1908_v38 }
 0x346   :  { %1454 = vmatprep.subr.bf16.mxu1 %v1738_v0 }
 0x347   :  { %1437 = vmatpush3.bf16.msra.mxu0 %v1436_v56 }
 0x348   :  { %1439 = vmatprep.subr.bf16.mxu0 %v1438_v59 }
 0x349   :  { %1456 = vmatpush3.bf16.msra.mxu1 %v1914_v41 }
 0x34a   :  { %1457 = vmatprep.subr.bf16.mxu1 %v1738_v0 }
 0x34b   :  { %1441 = vmatpush3.bf16.msra.mxu0 %v1440_v62 }
 0x34c   :  { %1466 = vmatprep.subr.bf16.mxu0 %v1738_v0 }
 0x34d   :  { %1459 = vmatpush3.bf16.msra.mxu1 %v1920_v44 }
 0x34e   :  { %1460 = vmatprep.subr.bf16.mxu1 %v1738_v0 }
 0x351   :  { %1462 = vmatpush3.bf16.msra.mxu1 %v1926_v47 }
 0x352   :  { %1463 = vmatprep.subr.bf16.mxu1 %v1738_v0 }
 0x355   :  { %1465 = vmatpush3.bf16.msra.mxu1 %v1932_v50 }
 0x356   :  { %1490 = vmatprep.subr.bf16.mxu1 %v1738_v0 }
 0x40b   :  { %v478_v8 = vpop.f32.mrb[2].mxu1 }
 0x40c   :  { %v479_v9 = vadd.f32 %v478_v8, %v405_v6  ;;  %v480_v10 = vpop.f32.mrb[3].mxu1 }
 0x40d   :  { %v481_v11 = vadd.f32 %v480_v10, %v409_v7 }
 0x40e   :  { %v485_v12 = vmul.f32 0.70710677, %v479_v9  ;;  %v483_v22 = vmul.f32 0.5, %v479_v9 }
 0x40f   :  { %v486_v13 = vmul.f32 0.70710677, %v481_v11  ;;  %v484_v20 = vmul.f32 0.5, %v481_v11 }
 0x410   :  { %1556 = verf.f32 %v485_v12 }
 0x411   :  { %1558 = verf.f32 %v486_v13 }
 0x41a   :  { %v1557_v14 = vpop.eup %1556 }
 0x41b   :  { %v1559_v16 = vpop.eup %1558  ;;  %v489_v17 = vadd.f32 1.0, %v1557_v14 }
 0x41c   :  { %v490_v21 = vadd.f32 1.0, %v1559_v16 }
 0x41d   :  { %v491_v25 = vmul.f32 %v489_v17, %v483_v22 }
 0x41e   :  { %v492_v23 = vmul.f32 %v490_v21, %v484_v20 }
 0x420   :  { %589 = vmatprep.mubr.f32.mxu0 %v492_v23 }
 0x421   :  { %590 = vmatmul.mubr.f32.vlgmr.msra.gmra.mrb[4].mxu0 %v491_v25 }
 0x422   :  { %1468 = vmatpush3.bf16.msra.mxu0 %v1878_v15  ;;  %1233 = vmatprep.mubr.msk.f32.mxu0 %vm1739_vm0, %v1740_v1 }
 0x423   :  { %1469 = vmatprep.subr.bf16.mxu0 %v1738_v0 }
 0x426   :  { %1471 = vmatpush3.bf16.msra.mxu0 %v1882_v18 }
 0x427   :  { %1472 = vmatprep.subr.bf16.mxu0 %v1738_v0 }
 0x42a   :  { %1474 = vmatpush3.bf16.msra.mxu0 %v1887_v24 }
 0x42b   :  { %1475 = vmatprep.subr.bf16.mxu0 %v1738_v0 }
 0x42e   :  { %1477 = vmatpush3.bf16.msra.mxu0 %v1908_v38 }
 0x42f   :  { %1478 = vmatprep.subr.bf16.mxu0 %v1738_v0 }
 0x432   :  { %1480 = vmatpush3.bf16.msra.mxu0 %v1914_v41 }
 0x433   :  { %1481 = vmatprep.subr.bf16.mxu0 %v1738_v0 }
 0x436   :  { %1483 = vmatpush3.bf16.msra.mxu0 %v1920_v44 }
 0x437   :  { %1484 = vmatprep.subr.bf16.mxu0 %v1738_v0 }
 0x43a   :  { %1486 = vmatpush3.bf16.msra.mxu0 %v1926_v47 }
 0x43b   :  { %1487 = vmatprep.subr.bf16.mxu0 %v1738_v0 }
 0x43e   :  { %1489 = vmatpush3.bf16.msra.mxu0 %v1932_v50 }
 0x43f   :  { %1514 = vmatprep.subr.bf16.mxu0 %v1738_v0 }
 0x4f4   :  { %v990_v26 = vpop.f32.mrb[4].mxu0 }
 0x4f5   :  { %v991_v35 = vpop.f32.mrb[5].mxu0 }
 0x4f6   :  { %v992_v19 = vadd.f32 %v991_v35, %v990_v26 }
 0x4f8   :  { %v592_v29 = vadd.f32 %v992_v19, %v124_v27 }
 0x4fa   :  { %1199 = vmatmul.mubr.f32.vlgmr.msra.gmra.mrb[4].mxu1 %v592_v29 }
 0x4fb   :  { %1492 = vmatpush3.bf16.msra.mxu1 %v1878_v15  ;;  %1268 = vmatprep.mubr.msk.f32.mxu1 %vm1739_vm0, %v1740_v1 }
 0x4fc   :  { %1493 = vmatprep.subr.bf16.mxu1 %v1738_v0 }
 0x4ff   :  { %1495 = vmatpush3.bf16.msra.mxu1 %v1882_v18 }
 0x500   :  { %1496 = vmatprep.subr.bf16.mxu1 %v1738_v0 }
 0x503   :  { %1498 = vmatpush3.bf16.msra.mxu1 %v1887_v24 }
 0x504   :  { %1499 = vmatprep.subr.bf16.mxu1 %v1738_v0 }
 0x507   :  { %1501 = vmatpush3.bf16.msra.mxu1 %v1908_v38 }
 0x508   :  { %1502 = vmatprep.subr.bf16.mxu1 %v1738_v0 }
 0x50b   :  { %1504 = vmatpush3.bf16.msra.mxu1 %v1914_v41 }
 0x50c   :  { %1505 = vmatprep.subr.bf16.mxu1 %v1738_v0 }
 0x50f   :  { %1507 = vmatpush3.bf16.msra.mxu1 %v1920_v44 }
 0x510   :  { %1508 = vmatprep.subr.bf16.mxu1 %v1738_v0 }
 0x513   :  { %1510 = vmatpush3.bf16.msra.mxu1 %v1926_v47 }
 0x514   :  { %1511 = vmatprep.subr.bf16.mxu1 %v1738_v0 }
 0x517   :  { %1513 = vmatpush3.bf16.msra.mxu1 %v1932_v50 }
 0x5cd   :  { %v661_v30 = vpop.f32.mrb[4].mxu1 }
 0x5ce   :  { %v665_v31 = vsub.f32 %v592_v29, %v661_v30  ;;  %v1200_v32 = vpop.f32.mrb[5].mxu1 }
 0x5d0   :  { %v666_v33 = vmul.f32 %v665_v31, %v665_v31 }
 0x5d2   :  { %1234 = vmatmul.mubr.f32.vlgmr.msra.gmra.mrb[6].mxu0 %v666_v33 }
 0x5d3   :  { %1516 = vmatpush3.bf16.msra.mxu0 %v1878_v15  ;;  %1303 = vmatprep.mubr.msk.f32.mxu0 %vm1739_vm0, %v1740_v1 }
 0x5d4   :  { %1517 = vmatprep.subr.bf16.mxu0 %v1738_v0 }
 0x5d7   :  { %1519 = vmatpush3.bf16.msra.mxu0 %v1882_v18 }
 0x5d8   :  { %1520 = vmatprep.subr.bf16.mxu0 %v1738_v0 }
 0x5db   :  { %1522 = vmatpush3.bf16.msra.mxu0 %v1887_v24 }
 0x5dc   :  { %1523 = vmatprep.subr.bf16.mxu0 %v1738_v0 }
 0x5df   :  { %1525 = vmatpush3.bf16.msra.mxu0 %v1908_v38  ;;  %v125_v38 = vld [vmem:[#allocation11 + $0x4] ss:$0 sm:$0xff] }
 0x5e0   :  { %1526 = vmatprep.subr.bf16.mxu0 %v1738_v0 }
 0x5e3   :  { %1528 = vmatpush3.bf16.msra.mxu0 %v1914_v41  ;;  %v126_v41 = vld [vmem:[#allocation11 + $0x5] ss:$0 sm:$0xff] }
 0x5e4   :  { %1529 = vmatprep.subr.bf16.mxu0 %v1738_v0 }
 0x5e7   :  { %1531 = vmatpush3.bf16.msra.mxu0 %v1920_v44 }
 0x5e8   :  { %1532 = vmatprep.subr.bf16.mxu0 %v1738_v0 }
 0x5eb   :  { %1534 = vmatpush3.bf16.msra.mxu0 %v1926_v47 }
 0x5ec   :  { %1535 = vmatprep.subr.bf16.mxu0 %v1738_v0 }
 0x5ef   :  { %1537 = vmatpush3.bf16.msra.mxu0 %v1932_v50 }
 0x6a5   :  { %v733_v1 = vpop.f32.mrb[6].mxu0 }
 0x6a6   :  { %v734_v15 = vadd.f32 1e-05, %v733_v1  ;;  %v1235_v18 = vpop.f32.mrb[7].mxu0 }
 0x6a8   :  { %1560 = vrsqrt.f32 %v734_v15 }
 0x6b2   :  { %v1561_v24 = vpop.eup %1560 }
 0x6b3   :  { %v738_v34 = vmul.f32 %v1561_v24, %v665_v31 }
 0x6b5   :  { %v739_v36 = vmul.f32 %v738_v34, %v125_v38 }
 0x6b7   :  { %v740_v37 = vadd.f32 %v739_v36, %v126_v41 }
 0x6b9   :  { %1269 = vmatmul.mubr.f32.vlgmr.msra.gmra.mrb[6].mxu1 %v740_v37 }
 0x78c   :  { %v807_v44 = vpop.f32.mrb[6].mxu1 }
 0x78d   :  { %v811_v39 = vsub.f32 %v740_v37, %v807_v44  ;;  %v1270_v40 = vpop.f32.mrb[7].mxu1 }
 0x78f   :  { %v812_v42 = vmul.f32 %v811_v39, %v811_v39 }
 0x791   :  { %1304 = vmatmul.mubr.f32.vlgmr.msra.gmra.mrb[8].mxu0 %v812_v42 }
 0x864   :  { %v879_v47 = vpop.f32.mrb[8].mxu0 }
 0x865   :  { %v880_v0 = vadd.f32 1e-05, %v879_v47  ;;  %v1305_v43 = vpop.f32.mrb[9].mxu0 }
 0x867   :  { %1562 = vrsqrt.f32 %v880_v0 }
 0x871   :  { %v1563_v50 = vpop.eup %1562 }
 0x872   :  { %v884_v46 = vmul.f32 %v1563_v50, %v811_v39 }
 0x874   :  { %v885_v49 = vmul.f32 %v884_v46, %v127_v45 }
 0x876   :  { %v886_v51 = vadd.f32 %v885_v49, %v128_v48 }
 0x878   :  { %v887_v52 = vadd.f32 %v886_v51, %v1944_v28 }
 0x87a   :  { %888 = vst [vmem:[#allocation13] sm:$0xff] %v887_v52 }
 0x87b   :  { %1707 = shalt.err (!%p1704_p10)
}
 0x87c   :  { %s1708_s22 = scalar_lea.hbm %s2037_s6, 128 }
 0x87d   :  { %p1709_p11 = scmp.ne.s32.totalorder %s2037_s6, %s1708_s22  ;;  %p1712_p12 = scmp.lt.u32.totalorder %s1708_s22, %s2037_s6 }
 0x87f   :  { %p1714_p13 = pnand %p1712_p12, %p1709_p11 }
 0x881   :  { %1717 = shalt.err (!%p1714_p13)
}
 0x882   :  { %898 = dma.vmem_to_hbm [thread:$0]  %s896_s8, 128, %s2037_s6, [#allocation4]  }
 0x883   :  { %1726 = dma.done.wait [#allocation4], 128  }
 0x884   :  { %1727 = vsyncadd [#allocation4], 4294967168 }
 0x885   :  { %902 = vsyncpa [#allocation3], 1 }
 0x886   :  { %903 = vsyncpa [#allocation6], 1 }
 0x887   :  { %904 = vsyncpa [#allocation9], 1 }
 0x888   :  { %905 = vsyncpa [#allocation12], 1 }
 0x889   :  { %906 = vsyncpa [#allocation4], 1 }

</bundles_post_ra>
